<compile_context>
chip_gen: v5e
topology: v5e:2x2
jax: 0.10.0
libtpu: 0.0.40
codegen_flags: <defaults>
</compile_context>

<pallas_src>
import functools

import jax
import jax.numpy as jnp
from jax.experimental import pallas as pl
from jax.experimental.pallas import tpu as pltpu

ALPHA = 0.25
GAMMA = 2.0
IGNORE_INDEX = -100
LABEL_SMOOTHING = 0.0

_VMEM_LIMIT_BYTES = 48 * 1024 * 1024     # requested scoped VMEM (fits v7x 64 MiB/TC)
_VMEM_SIZING_BUDGET = 24 * 1024 * 1024   # conservative budget used for tile sizing
_MAX_HBM_BLOCK_BYTES = 8 * 1024 * 1024   # diminishing returns past ~8 MiB/step


def _round_up(x, m):
    return -(-x // m) * m


def _focal_loss_kernel(logits_ref, tgt_ref, out_ref, *,
                       alpha, gamma, ignore_index, label_smoothing,
                       partial_sum):
    logits = logits_ref[...].astype(jnp.float32)          # (TILE_N, C)
    tgt = tgt_ref[...]                                     # (TILE_N, 1) int32
    tn, c = logits.shape

    # --- cross_entropy(reduction='none', ignore_index, label_smoothing) ---
    m = jnp.max(logits, axis=-1, keepdims=True)                      # (TILE_N, 1)
    sumexp = jnp.sum(jnp.exp(logits - m), axis=-1, keepdims=True)    # (TILE_N, 1)
    lse = m + jnp.log(sumexp)                                        # (TILE_N, 1)

    # -logp[target] = lse - logits[target]; pick logits[target] with a
    # compare+select on the raw logits (no logp materialization, and the
    # pick does not depend on m, so it can overlap the max/exp sweeps).
    # NOTE: out-of-range targets (other than ignore_index) select nothing
    # and silently yield loss = alpha*mod*lse; PyTorch would raise.
    col = jax.lax.broadcasted_iota(jnp.int32, (tn, c), 1)
    logit_tgt = jnp.sum(jnp.where(col == tgt, logits, 0.0),
                        axis=-1, keepdims=True)                      # (TILE_N, 1)
    nll_target = lse - logit_tgt

    if label_smoothing != 0.0:   # trace-time guard: skipped for default ls=0
        # mean over classes of -logp  ==  lse - mean(logits)
        smooth = lse - jnp.sum(logits, axis=-1, keepdims=True) / float(c)
        ce = (1.0 - label_smoothing) * nll_target + label_smoothing * smooth
    else:
        ce = nll_target

    # ignore_index rows contribute 0. Ragged-tail padding rows were given
    # ignore_index targets, so garbage/NaN from clipped boundary reads is
    # removed here too (jnp.where is a select, NaN cannot leak through).
    ce = jnp.where(tgt != ignore_index, ce, 0.0)            # (TILE_N, 1)

    # --- focal modulation ---
    pt = jnp.exp(-ce)
    one_minus_pt = 1.0 - pt
    g = float(gamma)
    if g == 2.0:
        mod = one_minus_pt * one_minus_pt                   # VPU, no pow/log(0)
    elif g == 1.0:
        mod = one_minus_pt
    elif g == 0.0:
        mod = jnp.ones_like(one_minus_pt)
    else:
        # clamp: fp rounding can give ce < 0 -> pt > 1 -> log(negative) = NaN
        mod = jnp.maximum(one_minus_pt, 0.0) ** gamma

    focal = alpha * mod * ce                                # (TILE_N, 1)

    if partial_sum:
        # One partial sum per tile (out block (1,1,1)): no per-row writeback
        # and no second pass over N in the wrapper.
        out_ref[0] = jnp.sum(focal, axis=0, keepdims=True)
    else:
        out_ref[...] = focal


def _pick_tile_n(n, c, itemsize):
    """Pick TILE_N so the tile's estimated VMEM footprint stays well under budget.

    dtype-aware: sublane alignment is 8 rows (f32), 16 (bf16), 32 (1-byte
    dtypes). C is lane-padded to a multiple of 128 for VMEM budgeting since
    for small C the VMEM footprint exceeds the HBM bytes moved.
    """
    align = max(8, 32 // itemsize)
    c_pad = _round_up(max(c, 128), 128)

    # Rough per-row VMEM bytes: double-buffered input block + ~3 live
    # lane-padded f32 full-width temporaries (exp / iota / select) + ~6 live
    # (TILE_N, 1) f32 per-row temporaries (each costs one 128-lane vreg row).
    bytes_per_row = 2 * c_pad * itemsize + 3 * c_pad * 4 + 6 * 128 * 4

    t = _VMEM_SIZING_BUDGET // bytes_per_row
    t = min(t, max(1, _MAX_HBM_BLOCK_BYTES // (c * itemsize)))
    t = max(align, (t // align) * align)

    if n >= align:
        # Keep the block no larger than the array, so at most the last block
        # is a (supported) clipped boundary block.
        t = min(t, (n // align) * align)
    return max(align, t)


def focal_loss(logits, targets, *, alpha=ALPHA, gamma=GAMMA,
               ignore_index=IGNORE_INDEX, reduction='mean',
               label_smoothing=LABEL_SMOOTHING):
    """logits: (N, C) float (f32 or bf16); targets: (N,) int.

    Returns scalar f32 for 'mean'/'sum', (N,) f32 for 'none'.
    NOTE: 'mean' divides by N including ignore_index rows — this matches the
    PyTorch module (cross_entropy(reduction='none') then .mean()), which
    differs from F.cross_entropy(reduction='mean').
    """
    if reduction not in ('mean', 'sum', 'none'):
        raise ValueError('Wrong reduction.')

    n, c = logits.shape
    itemsize = jnp.dtype(logits.dtype).itemsize
    tile_n = _pick_tile_n(n, c, itemsize)

    tgt2d = targets.astype(jnp.int32).reshape(n, 1)

    if n < tile_n:
        # Tiny-N corner case (n < one sublane tile): pad both, cost is <32 rows.
        logits = jnp.pad(logits, ((0, tile_n - n), (0, 0)))
        tgt2d = jnp.pad(tgt2d, ((0, tile_n - n), (0, 0)),
                        constant_values=ignore_index)

    num_tiles = pl.cdiv(max(n, tile_n), tile_n)
    n_pad = num_tiles * tile_n
    if tgt2d.shape[0] != n_pad:
        # Only the tiny targets array is padded for the ragged tail; logits
        # stay un-copied in HBM and the last block is a clipped boundary read
        # whose padding rows are masked via ignore_index targets.
        tgt2d = jnp.pad(tgt2d, ((0, n_pad - tgt2d.shape[0]), (0, 0)),
                        constant_values=ignore_index)

    partial_sum = reduction in ('mean', 'sum')
    kernel = functools.partial(
        _focal_loss_kernel,
        alpha=alpha, gamma=gamma, ignore_index=ignore_index,
        label_smoothing=label_smoothing, partial_sum=partial_sum)

    in_specs = [
        pl.BlockSpec((tile_n, c), lambda i: (i, 0)),   # streamed logits tile
        pl.BlockSpec((tile_n, 1), lambda i: (i, 0)),   # targets tile
    ]
    if partial_sum:
        # Per-tile partial sums; last two block dims equal the full array
        # dims (1, 1), so no lane-sparse per-row writeback.
        out_shape = jax.ShapeDtypeStruct((num_tiles, 1, 1), jnp.float32)
        out_specs = pl.BlockSpec((1, 1, 1), lambda i: (i, 0, 0))
    else:
        # TODO(synk): lane-dense (num_tiles, 1, tile_n) layout for 'none'
        # would avoid masked vst.msk stores; kept (N, 1) for robustness.
        out_shape = jax.ShapeDtypeStruct((n_pad, 1), jnp.float32)
        out_specs = pl.BlockSpec((tile_n, 1), lambda i: (i, 0))

    # TODO(synk): for C << 128, fold 128//C rows per vreg (free wrapper
    # reshape (N, C) -> (N//k, k*C)) with segmented lane reductions to recover
    # lane occupancy once compute-bound on v7x.
    out = pl.pallas_call(
        kernel,
        out_shape=out_shape,
        grid_spec=pltpu.PrefetchScalarGridSpec(
            num_scalar_prefetch=0,
            grid=(num_tiles,),
            in_specs=in_specs,
            out_specs=out_specs,
        ),
        compiler_params=pltpu.CompilerParams(
            dimension_semantics=("parallel",),   # independent tiles -> 2 TCs on v7x
            vmem_limit_bytes=_VMEM_LIMIT_BYTES,
        ),
    )(logits, tgt2d)

    if reduction == 'mean':
        return jnp.sum(out) / float(n)
    elif reduction == 'sum':
        return jnp.sum(out)
    else:
        return out[:n, 0]


def _reference_focal_loss(logits, targets, reduction='mean'):
    # Pure-JAX reference mirroring the PyTorch module.
    logits = logits.astype(jnp.float32)
    logp = jax.nn.log_softmax(logits, axis=-1)
    safe_t = jnp.where(targets == IGNORE_INDEX, 0, targets).astype(jnp.int32)
    nll = -jnp.take_along_axis(logp, safe_t[:, None], axis=-1)[:, 0]
    ce = jnp.where(targets == IGNORE_INDEX, 0.0, nll)
    pt = jnp.exp(-ce)
    fl = ALPHA * (1.0 - pt) ** GAMMA * ce
    if reduction == 'mean':
        return fl.mean()
    if reduction == 'sum':
        return fl.sum()
    return fl


if __name__ == "__main__":
    key = jax.random.PRNGKey(0)
    k1, k2, k3, k4, k5, k6 = jax.random.split(key, 6)

    # Case 1: small, N multiple of 8, with an ignore_index row; all reductions.
    N1, C1 = 8, 32
    logits1 = jax.random.normal(k1, (N1, C1), dtype=jnp.float32)
    targets1 = jax.random.randint(k2, (N1,), 0, C1, dtype=jnp.int32)
    targets1 = targets1.at[3].set(IGNORE_INDEX)
    out1 = jax.block_until_ready(focal_loss(logits1, targets1))
    ref1 = _reference_focal_loss(logits1, targets1)
    assert jnp.allclose(out1, ref1, atol=1e-5, rtol=1e-5), (out1, ref1)

    out1s = jax.block_until_ready(focal_loss(logits1, targets1, reduction='sum'))
    ref1s = _reference_focal_loss(logits1, targets1, reduction='sum')
    assert jnp.allclose(out1s, ref1s, atol=1e-5, rtol=1e-5), (out1s, ref1s)

    out1n = jax.block_until_ready(focal_loss(logits1, targets1, reduction='none'))
    ref1n = _reference_focal_loss(logits1, targets1, reduction='none')
    assert jnp.allclose(out1n, ref1n, atol=1e-5, rtol=1e-5), (out1n, ref1n)

    # Case 2: N not a multiple of the tile (ragged tail, logits NOT padded).
    N2, C2 = 13, 32
    logits2 = jax.random.normal(k3, (N2, C2), dtype=jnp.float32)
    targets2 = jax.random.randint(k4, (N2,), 0, C2, dtype=jnp.int32)
    targets2 = targets2.at[7].set(IGNORE_INDEX)
    out2 = jax.block_until_ready(focal_loss(logits2, targets2))
    ref2 = _reference_focal_loss(logits2, targets2)
    assert jnp.allclose(out2, ref2, atol=1e-5, rtol=1e-5), (out2, ref2)

    # Case 3: multi-tile + ragged tail + per-tile partial sums.
    N3, C3 = 300, 160
    logits3 = jax.random.normal(k5, (N3, C3), dtype=jnp.float32)
    targets3 = jax.random.randint(k6, (N3,), 0, C3, dtype=jnp.int32)
    targets3 = targets3.at[0].set(IGNORE_INDEX)
    out3 = jax.block_until_ready(focal_loss(logits3, targets3))
    ref3 = _reference_focal_loss(logits3, targets3)
    assert jnp.allclose(out3, ref3, atol=1e-5, rtol=1e-5), (out3, ref3)

    # Case 4: bf16 logits (dtype-aware tile alignment path).
    logits4 = logits3.astype(jnp.bfloat16)
    out4 = jax.block_until_ready(focal_loss(logits4, targets3))
    ref4 = _reference_focal_loss(logits4, targets3)
    assert jnp.allclose(out4, ref4, atol=1e-4, rtol=1e-4), (out4, ref4)

    print("KERNEL_OK")
</pallas_src>

<mosaic_0001>
module attributes {stable_mosaic.version = 11 : i64} {
  func.func @_focal_loss_kernel(%arg0: i32, %arg1: memref<8x32xf32, #tpu.memory_space<vmem>>, %arg2: memref<8x1xi32, #tpu.memory_space<vmem>>, %arg3: memref<1x1x1xf32, #tpu.memory_space<vmem>>) attributes {dimension_semantics = [#tpu.dimension_semantics<parallel>], iteration_bounds = array<i64: 1>, scalar_prefetch = 0 : i64, scratch_operands = 0 : i64, tpu.core_type = #tpu.core_type<tc>, window_params = [{transform_indices = @transform_0, window_bounds = array<i64: 8, 32>}, {transform_indices = @transform_1, window_bounds = array<i64: 8, 1>}, {transform_indices = @transform_2, window_bounds = array<i64: 1, 1, 1>}]} {
    %c0 = arith.constant 0 : index
    %c0_0 = arith.constant 0 : index
    %0 = vector.load %arg1[%c0, %c0_0] : memref<8x32xf32, #tpu.memory_space<vmem>>, vector<8x32xf32>
    %c0_1 = arith.constant 0 : index
    %c0_2 = arith.constant 0 : index
    %1 = vector.load %arg2[%c0_1, %c0_2] : memref<8x1xi32, #tpu.memory_space<vmem>>, vector<8x1xi32>
    %cst = arith.constant dense<0xFF800000> : vector<8xf32>
    %2 = vector.multi_reduction <maximumf>, %0, %cst [1] : vector<8x32xf32> to vector<8xf32>
    %3 = vector.shape_cast %2 : vector<8xf32> to vector<8x1xf32>
    %4 = vector.broadcast %3 : vector<8x1xf32> to vector<8x32xf32>
    %5 = arith.subf %0, %4 : vector<8x32xf32>
    %6 = math.exp %5 : vector<8x32xf32>
    %cst_3 = arith.constant dense<0.000000e+00> : vector<8xf32>
    %7 = vector.multi_reduction <add>, %6, %cst_3 [1] : vector<8x32xf32> to vector<8xf32>
    %8 = vector.shape_cast %7 : vector<8xf32> to vector<8x1xf32>
    %9 = math.log %8 : vector<8x1xf32>
    %10 = arith.addf %3, %9 : vector<8x1xf32>
    %11 = tpu.iota {dimensions = array<i32: 1>} : vector<8x32xi32>
    %12 = vector.broadcast %1 : vector<8x1xi32> to vector<8x32xi32>
    %13 = arith.cmpi eq, %11, %12 : vector<8x32xi32>
    %cst_4 = arith.constant 0.000000e+00 : f32
    %14 = vector.broadcast %cst_4 : f32 to vector<8x32xf32>
    %15 = arith.select %13, %0, %14 : vector<8x32xi1>, vector<8x32xf32>
    %cst_5 = arith.constant dense<0.000000e+00> : vector<8xf32>
    %16 = vector.multi_reduction <add>, %15, %cst_5 [1] : vector<8x32xf32> to vector<8xf32>
    %17 = vector.shape_cast %16 : vector<8xf32> to vector<8x1xf32>
    %18 = arith.subf %10, %17 : vector<8x1xf32>
    %c-100_i32 = arith.constant -100 : i32
    %19 = vector.broadcast %c-100_i32 : i32 to vector<8x1xi32>
    %20 = arith.cmpi ne, %1, %19 : vector<8x1xi32>
    %cst_6 = arith.constant 0.000000e+00 : f32
    %21 = vector.broadcast %cst_6 : f32 to vector<8x1xf32>
    %22 = arith.select %20, %18, %21 : vector<8x1xi1>, vector<8x1xf32>
    %cst_7 = arith.constant 0.000000e+00 : f32
    %23 = vector.broadcast %cst_7 : f32 to vector<8x1xf32>
    %24 = arith.subf %23, %22 : vector<8x1xf32>
    %25 = math.exp %24 : vector<8x1xf32>
    %cst_8 = arith.constant 1.000000e+00 : f32
    %26 = vector.broadcast %cst_8 : f32 to vector<8x1xf32>
    %27 = arith.subf %26, %25 : vector<8x1xf32>
    %28 = arith.mulf %27, %27 : vector<8x1xf32>
    %cst_9 = arith.constant 2.500000e-01 : f32
    %29 = vector.broadcast %cst_9 : f32 to vector<8x1xf32>
    %30 = arith.mulf %29, %28 : vector<8x1xf32>
    %31 = arith.mulf %30, %22 : vector<8x1xf32>
    %cst_10 = arith.constant dense<0.000000e+00> : vector<1xf32>
    %32 = vector.multi_reduction <add>, %31, %cst_10 [0] : vector<8x1xf32> to vector<1xf32>
    %33 = vector.shape_cast %32 : vector<1xf32> to vector<1x1xf32>
    %c0_11 = arith.constant 0 : index
    %c0_12 = arith.constant 0 : index
    %c0_13 = arith.constant 0 : index
    %34 = vector.load %arg3[%c0_11, %c0_12, %c0_13] : memref<1x1x1xf32, #tpu.memory_space<vmem>>, vector<1x1x1xf32>
    %35 = vector.shape_cast %34 : vector<1x1x1xf32> to vector<1x1xf32>
    %36 = vector.shape_cast %33 : vector<1x1xf32> to vector<1x1x1xf32>
    tpu.vector_store %arg3[%c0_11, %c0_12, %c0_13], %36 {strides = array<i32>} : memref<1x1x1xf32, #tpu.memory_space<vmem>>, vector<1x1x1xf32>,
    return
  }
  func.func @transform_0(%arg0: i32) -> (i32, i32) {
    %c0_i32 = arith.constant 0 : i32
    %c0_i32_0 = arith.constant 0 : i32
    return %arg0, %c0_i32 : i32, i32
  }
  func.func @transform_1(%arg0: i32) -> (i32, i32) {
    %c0_i32 = arith.constant 0 : i32
    %c0_i32_0 = arith.constant 0 : i32
    return %arg0, %c0_i32 : i32, i32
  }
  func.func @transform_2(%arg0: i32) -> (i32, i32, i32) {
    %c0_i32 = arith.constant 0 : i32
    %c0_i32_0 = arith.constant 0 : i32
    %c0_i32_1 = arith.constant 0 : i32
    return %arg0, %c0_i32, %c0_i32_0 : i32, i32, i32
  }
}

</mosaic_0001>

<bundles_post_ra>
// kernel: tpu_custom_call.1
= control target key start
LH: loop header
LB: loop body
LE: loop exit
PB: predicated region body
PF: predicated region fallthrough
CT: control target
= control target key end

     0   :  { %vm14_vm0 = vcmask 261120   ;;  %s137_s0 = inlined_call_operand.vmem [shape: f32[8,32], index: 0, kind: input, shape index: {}]   ;;  %s138_s1 = inlined_call_operand.vmem [shape: s32[8,1], index: 1, kind: input, shape index: {}]   ;;  %s139_s2 = inlined_call_operand.hbm [shape: f32[1,1,1], index: 2, kind: output, shape index: {}]  }
   0x1   :  { %v12_v0 = vld [vmem:[%s137_s0] sm:$0xff] }
   0x2   :  { %7 = vsyncpa [#allocation3], 0  ;;  %v15_v1 = vsel %vm14_vm0, %v12_v0, -inf  ;;  %v108_v2 = vmov 0   ;;  %v13_v3 = vld [vmem:[%s138_s1] sm:$0xff]  ;;  %v27_v9 = vlaneseq  ;;  %vm47_vm3 = vcmask 7168  }
   0x3   :  { %75 = vset.pattern.permute.xlu0 %v108_v2  ;;  %vm38_vm2 = vcmp.ne.s32.totalorder %v13_v3, 4294967196  ;;  %s109_s0 = smov [#allocation2]   ;;  %s64_s15 = sshll.u32 %s139_s2, 4  ;;  %vm55_vm4 = vcmask 0   ;;  %s65_s15 = int_to_ptr.hbm [resolvable:$true] %s64_s15 }
   0x4   :  { %16 = vmax.xlane.f32.xlu0 %v15_v1  ;;  %v28_v10 = vand.u32 127, %v27_v9  ;;  %s62_s1 = sshll.u32 %s109_s0, 4  ;;  %s63_s1 = int_to_ptr.vmem [resolvable:$true] %s62_s1 }
  0x18   :  { %30 = vperm.xlu0 %75, %v13_v3  }
  0x77   :  { %v17_v4 = vpop.xlane.xlu0 %16 }
  0x78   :  { %v18_v5 = vsub.f32 %v12_v0, %v17_v4 }
  0x7a   :  { %v19_v6 = vmul.f32 1.442695, %v18_v5 }
  0x7c   :  { %76 = vpow2.f32 %v19_v6 }
  0x82   :  { %v77_v7 = vpop.eup %76 }
  0x83   :  { %v21_v8 = vsel %vm14_vm0, %v77_v7, 0.0 }
  0x84   :  { %22 = vadd.xlane.f32.xlu1 %v21_v8 }
  0x8a   :  { %v31_v11 = vpop.permute.xlu0 %30 }
  0x8b   :  { %vm32_vm1 = vcmp.eq.s32.totalorder %v28_v10, %v31_v11 }
  0x8c   :  { %v33_v12 = vsel %vm32_vm1, %v12_v0, 0.0 }
  0x8d   :  { %v34_v13 = vsel %vm14_vm0, %v33_v12, 0.0 }
  0x8e   :  { %35 = vadd.xlane.f32.xlu1 %v34_v13 }
  0xf7   :  { %v23_v14 = vpop.xlane.xlu1 %22 }
  0xf8   :  { %78 = vlog2.f32 %v23_v14 }
  0xfe   :  { %v79_v15 = vpop.eup %78 }
  0xff   :  { %v25_v16 = vmul.f32 0.6931472, %v79_v15 }
 0x101   :  { %v26_v17 = vadd.f32 %v25_v16, %v17_v4  ;;  %v36_v18 = vpop.xlane.xlu1 %35 }
 0x103   :  { %v37_v19 = vsub.f32 %v26_v17, %v36_v18 }
 0x105   :  { %v39_v20 = vsel %vm38_vm2, %v37_v19, 0.0 }
 0x106   :  { %v40_v21 = vsub.f32 0.0, %v39_v20 }
 0x108   :  { %v41_v22 = vmul.f32 1.442695, %v40_v21 }
 0x10a   :  { %80 = vpow2.f32 %v41_v22 }
 0x110   :  { %v81_v23 = vpop.eup %80 }
 0x111   :  { %v43_v24 = vsub.f32 1.0, %v81_v23 }
 0x113   :  { %v44_v25 = vmul.f32 %v43_v24, %v43_v24 }
 0x115   :  { %v45_v26 = vmul.f32 0.25, %v44_v25 }
 0x117   :  { %v46_v27 = vmul.f32 %v45_v26, %v39_v20 }
 0x119   :  { %v48_v28 = vsel %vm47_vm3, %v46_v27, 0.0 }
 0x11a   :  { %v49_v29 = vrot.slane %v48_v28, 4 }
 0x11c   :  { %v50_v30 = vadd.f32 %v49_v29, %v48_v28 }
 0x11e   :  { %v51_v31 = vrot.slane %v50_v30, 2 }
 0x120   :  { %v52_v32 = vadd.f32 %v51_v31, %v50_v30 }
 0x122   :  { %v53_v33 = vrot.slane %v52_v32, 1 }
 0x124   :  { %v54_v34 = vadd.f32 %v53_v33, %v52_v32 }
 0x126   :  { %56 = vst.msk [vmem:[#allocation2] sm:$0x1] %vm55_vm4, %v54_v34 }
 0x127   :  { %67 = dma.vmem_to_hbm [thread:$0]  %s63_s1, 16, %s65_s15, [#allocation3]  }
 0x128   :  { %106 = dma.done.wait [#allocation3], 16  }
 0x129   :  { %107 = vsyncadd [#allocation3], 4294967280 }
 0x12a   :  { %72 = vsyncpa [#allocation3], 1 }

</bundles_post_ra>
